<compile_context>
chip_gen: v5e
topology: v5e:2x2
jax: 0.10.0
libtpu: 0.0.40
codegen_flags: <defaults>
</compile_context>

<pallas_src>
import jax
import jax.numpy as jnp
from jax.experimental import pallas as pl
from jax.experimental.pallas import tpu as pltpu

NUM_OF_INPUT = 3
HIDDEN = 30
OUT = 1

KP = 8          # input features padded to the f32 sublane granule
HP = 32         # hidden width padded to the f32/bf16 sublane granules
NSLAB = 16      # lanes in the packed f32 parameter slab (KP + 5 used, rest 0)

# Column layout of the packed f32 slab (HP, NSLAB):
#   cols 0..KP-1 : w1 (zero-padded to (HP, KP))
_C_B1 = KP      # col KP   : b1
_C_B2 = KP + 1  # col KP+1 : b2
_C_B3 = KP + 2  # col KP+2 : b3
_C_WO = KP + 3  # col KP+3 : wo (output weights as a column)
_C_BO = KP + 4  # [0, KP+4]: bo (output bias, scalar)


def mlp_kernel(x_ref, fp_ref, w23_ref, o_ref):
    """One batch tile.  Activations are laid out as (features, batch_tile)."""
    x = x_ref[...]                                 # (KP, TB) f32, rows 3..7 zero

    w1 = fp_ref[:, 0:KP]                           # (HP, KP) f32
    b1 = fp_ref[:, _C_B1:_C_B1 + 1]                # (HP, 1)
    b2 = fp_ref[:, _C_B2:_C_B2 + 1]
    b3 = fp_ref[:, _C_B3:_C_B3 + 1]
    wo = fp_ref[:, _C_WO:_C_WO + 1]
    bo = fp_ref[0:1, _C_BO:_C_BO + 1]              # (1, 1)

    # ---- hid1 + relu: K padded 3->8, f32 MXU dot (keeps the VALU slot free) --
    h = jnp.dot(w1, x, preferred_element_type=jnp.float32) + b1   # (HP, TB)
    h = jnp.maximum(h, 0.0)

    # ---- hid2 + relu: 32x32 bf16 MXU, f32 accumulate ----
    h = jnp.dot(w23_ref[0], h.astype(jnp.bfloat16),
                preferred_element_type=jnp.float32) + b2
    h = jnp.maximum(h, 0.0)

    # ---- hid3 + relu ----
    h = jnp.dot(w23_ref[1], h.astype(jnp.bfloat16),
                preferred_element_type=jnp.float32) + b3
    h = jnp.maximum(h, 0.0)

    # ---- output (N=1): VPU multiply + cross-sublane (XLU) reduce,
    #      single lane-dense (1, TB) f32 store ----
    o_ref[...] = jnp.sum(h * wo, axis=0, keepdims=True) + bo


def pack_params(params):
    """Pack PyTorch-layout params into the two VMEM-resident kernel operands."""
    w1, b1, w2, b2, w3, b3, wo, bo = params   # weights (out,in), biases (out,)

    f32 = jnp.zeros((HP, NSLAB), jnp.float32)
    f32 = f32.at[:HIDDEN, :NUM_OF_INPUT].set(w1)
    f32 = f32.at[:HIDDEN, _C_B1].set(b1)
    f32 = f32.at[:HIDDEN, _C_B2].set(b2)
    f32 = f32.at[:HIDDEN, _C_B3].set(b3)
    f32 = f32.at[:HIDDEN, _C_WO].set(wo[0])       # wo: (1, 30) -> column
    f32 = f32.at[0, _C_BO].set(bo[0])

    w23 = jnp.zeros((2, HP, HP), jnp.bfloat16)
    w23 = w23.at[0, :HIDDEN, :HIDDEN].set(w2.astype(jnp.bfloat16))
    w23 = w23.at[1, :HIDDEN, :HIDDEN].set(w3.astype(jnp.bfloat16))
    return f32, w23


def _choose_tile(B, batch_tile):
    """Lane-aligned batch tile; >= 2 grid steps when possible (v7x megacore)."""
    bp128 = pl.cdiv(B, 128) * 128
    tb = min(batch_tile, bp128)
    if bp128 >= 2 * 128 and tb >= bp128:
        tb = pl.cdiv(bp128 // 2, 128) * 128   # split so both v7x TCs get work
    bp = pl.cdiv(B, tb) * tb                  # padded batch
    return tb, bp


def net_forward(x, packed_params, *, batch_tile=2048, x_is_transposed=False):
    """x: (B, 3) f32 (or feature-major (3, B)/(8, B) with x_is_transposed=True)
    -> (B, 1) f32."""
    fp_slab, w23 = packed_params

    if x_is_transposed:
        F, B = x.shape
    else:
        B, F = x.shape

    tb, bp = _choose_tile(B, batch_tile)

    if x_is_transposed:
        # Feature-major input from the producer: no wrapper transpose needed.
        x_t = x.astype(jnp.float32)
        if F != KP:
            x_t = jnp.concatenate(
                [x_t, jnp.zeros((KP - F, B), jnp.float32)], axis=0)
        if bp != B:
            x_t = jnp.pad(x_t, ((0, 0), (0, bp - B)))
    else:
        # Single pad + transpose so batch sits on the 128-lane axis and the
        # contraction depth is padded to 8 sublanes for the layer-1 MXU dot.
        x_t = jnp.pad(x.astype(jnp.float32),
                      ((0, bp - B), (0, KP - F))).T          # (KP, bp)

    flops = 2 * bp * (NUM_OF_INPUT * HIDDEN + 2 * HIDDEN * HIDDEN + HIDDEN)
    bytes_accessed = 4 * bp * (KP + OUT) + 4 * HP * NSLAB + 2 * 2 * HP * HP
    cost = pl.CostEstimate(flops=flops, transcendentals=0,
                           bytes_accessed=bytes_accessed)

    resident2 = lambda i: (0, 0)
    resident3 = lambda i: (0, 0, 0)
    out = pl.pallas_call(
        mlp_kernel,
        out_shape=jax.ShapeDtypeStruct((1, bp), jnp.float32),
        grid=(bp // tb,),
        in_specs=[
            pl.BlockSpec((KP, tb), lambda i: (0, i)),     # x^T batch tile
            pl.BlockSpec((HP, NSLAB), resident2),         # packed f32 slab
            pl.BlockSpec((2, HP, HP), resident3),         # w2/w3 bf16 slab
        ],
        out_specs=pl.BlockSpec((1, tb), lambda i: (0, i)),
        compiler_params=pltpu.CompilerParams(
            dimension_semantics=("parallel",)),           # v7x: shard over 2 TCs
        cost_estimate=cost,
    )(x_t, fp_slab, w23)

    return out[0, :B].reshape(B, OUT)


def init_params(key):
    """PyTorch nn.Linear-style init (uniform +/- 1/sqrt(fan_in)).

    Weights in PyTorch (out_features, in_features) layout; biases 1-D."""
    def linear(key, fan_in, fan_out):
        kw, kb = jax.random.split(key)
        bound = 1.0 / jnp.sqrt(jnp.float32(fan_in))
        w = jax.random.uniform(kw, (fan_out, fan_in), jnp.float32, -bound, bound)
        b = jax.random.uniform(kb, (fan_out,), jnp.float32, -bound, bound)
        return w, b

    k1, k2, k3, ko = jax.random.split(key, 4)
    w1, b1 = linear(k1, NUM_OF_INPUT, HIDDEN)
    w2, b2 = linear(k2, HIDDEN, HIDDEN)
    w3, b3 = linear(k3, HIDDEN, HIDDEN)
    wo, bo = linear(ko, HIDDEN, OUT)
    return (w1, b1, w2, b2, w3, b3, wo, bo)


def net_forward_ref(x, params, emulate_bf16=True):
    """Plain-JAX reference with PyTorch semantics (z = x @ W.T + b).

    With emulate_bf16=True the two hidden layers mirror the kernel's bf16 MXU
    inputs (f32 accumulation), so the comparison tolerance stays tight."""
    w1, b1, w2, b2, w3, b3, wo, bo = params

    def mm(a, w):
        if emulate_bf16:
            return jnp.dot(a.astype(jnp.bfloat16), w.astype(jnp.bfloat16).T,
                           preferred_element_type=jnp.float32)
        return a @ w.T

    z = jnp.maximum(x @ w1.T + b1, 0.0)
    z = jnp.maximum(mm(z, w2) + b2, 0.0)
    z = jnp.maximum(mm(z, w3) + b3, 0.0)
    return z @ wo.T + bo


if __name__ == "__main__":
    key = jax.random.PRNGKey(0)
    kx, kx2, kp = jax.random.split(key, 3)

    params = init_params(kp)
    packed = pack_params(params)   # pack once; reused across calls

    # Tiny demo batch (pads to a single lane-aligned 128-row tile).
    B = 8
    x = jax.random.normal(kx, (B, NUM_OF_INPUT), jnp.float32)
    out = jax.block_until_ready(net_forward(x, packed))
    assert out.shape == (B, OUT), out.shape
    ref = net_forward_ref(x, params, emulate_bf16=True)
    assert jnp.allclose(out, ref, atol=2e-3, rtol=2e-3), (
        "mismatch vs reference (B=8): max abs diff = "
        f"{float(jnp.max(jnp.abs(out - ref)))}")

    # Second (still small) batch that exercises the multi-step grid path.
    B2 = 300
    x2 = jax.random.normal(kx2, (B2, NUM_OF_INPUT), jnp.float32)
    out2 = jax.block_until_ready(net_forward(x2, packed))
    assert out2.shape == (B2, OUT), out2.shape
    ref2 = net_forward_ref(x2, params, emulate_bf16=True)
    assert jnp.allclose(out2, ref2, atol=2e-3, rtol=2e-3), (
        "mismatch vs reference (B=300): max abs diff = "
        f"{float(jnp.max(jnp.abs(out2 - ref2)))}")

    print("KERNEL_OK")
</pallas_src>

<mosaic_0001>
module attributes {stable_mosaic.version = 11 : i64} {
  func.func @mlp_kernel(%arg0: i32, %arg1: memref<8x128xf32, #tpu.memory_space<vmem>>, %arg2: memref<32x16xf32, #tpu.memory_space<vmem>>, %arg3: memref<2x32x32xbf16, #tpu.memory_space<vmem>>, %arg4: memref<1x128xf32, #tpu.memory_space<vmem>>) attributes {dimension_semantics = [#tpu.dimension_semantics<parallel>], iteration_bounds = array<i64: 1>, scalar_prefetch = 0 : i64, scratch_operands = 0 : i64, tpu.core_type = #tpu.core_type<tc>, window_params = [{transform_indices = @transform_0, window_bounds = array<i64: 8, 128>}, {pipeline_mode = #tpu.pipeline_mode<synchronous>, transform_indices = @transform_1, window_bounds = array<i64: 32, 16>}, {pipeline_mode = #tpu.pipeline_mode<synchronous>, transform_indices = @transform_2, window_bounds = array<i64: 2, 32, 32>}, {transform_indices = @transform_3, window_bounds = array<i64: 1, 128>}]} {
    %c0 = arith.constant 0 : index
    %c0_0 = arith.constant 0 : index
    %0 = vector.load %arg1[%c0, %c0_0] : memref<8x128xf32, #tpu.memory_space<vmem>>, vector<8x128xf32>
    %c0_1 = arith.constant 0 : index
    %c0_2 = arith.constant 0 : index
    %1 = vector.load %arg2[%c0_1, %c0_2] : memref<32x16xf32, #tpu.memory_space<vmem>>, vector<32x8xf32>
    %c0_3 = arith.constant 0 : index
    %c8 = arith.constant 8 : index
    %2 = vector.load %arg2[%c0_3, %c8] : memref<32x16xf32, #tpu.memory_space<vmem>>, vector<32x1xf32>
    %c0_4 = arith.constant 0 : index
    %c9 = arith.constant 9 : index
    %3 = vector.load %arg2[%c0_4, %c9] : memref<32x16xf32, #tpu.memory_space<vmem>>, vector<32x1xf32>
    %c0_5 = arith.constant 0 : index
    %c10 = arith.constant 10 : index
    %4 = vector.load %arg2[%c0_5, %c10] : memref<32x16xf32, #tpu.memory_space<vmem>>, vector<32x1xf32>
    %c0_6 = arith.constant 0 : index
    %c11 = arith.constant 11 : index
    %5 = vector.load %arg2[%c0_6, %c11] : memref<32x16xf32, #tpu.memory_space<vmem>>, vector<32x1xf32>
    %c0_7 = arith.constant 0 : index
    %c12 = arith.constant 12 : index
    %6 = vector.load %arg2[%c0_7, %c12] : memref<32x16xf32, #tpu.memory_space<vmem>>, vector<1x1xf32>
    %cst = arith.constant dense<0.000000e+00> : vector<32x128xf32>
    %7 = tpu.matmul %1, %0, %cst {dimension_numbers = #tpu.dot_dimension_numbers<[1], [0], [0], [1], [0, 0, 1, 1], [], []>} : vector<32x8xf32>, vector<8x128xf32>, vector<32x128xf32> -> vector<32x128xf32>
    %8 = vector.broadcast %2 : vector<32x1xf32> to vector<32x128xf32>
    %9 = arith.addf %7, %8 : vector<32x128xf32>
    %cst_8 = arith.constant 0.000000e+00 : f32
    %10 = vector.broadcast %cst_8 : f32 to vector<32x128xf32>
    %11 = arith.maximumf %9, %10 : vector<32x128xf32>
    %c0_9 = arith.constant 0 : index
    %c0_10 = arith.constant 0 : index
    %c0_11 = arith.constant 0 : index
    %12 = vector.load %arg3[%c0_9, %c0_10, %c0_11] : memref<2x32x32xbf16, #tpu.memory_space<vmem>>, vector<1x32x32xbf16>
    %13 = vector.shape_cast %12 : vector<1x32x32xbf16> to vector<32x32xbf16>
    %14 = arith.truncf %11 : vector<32x128xf32> to vector<32x128xbf16>
    %cst_12 = arith.constant dense<0.000000e+00> : vector<32x128xf32>
    %15 = tpu.matmul %13, %14, %cst_12 {dimension_numbers = #tpu.dot_dimension_numbers<[1], [0], [0], [1], [0, 0, 1, 1], [], []>} : vector<32x32xbf16>, vector<32x128xbf16>, vector<32x128xf32> -> vector<32x128xf32>
    %16 = vector.broadcast %3 : vector<32x1xf32> to vector<32x128xf32>
    %17 = arith.addf %15, %16 : vector<32x128xf32>
    %cst_13 = arith.constant 0.000000e+00 : f32
    %18 = vector.broadcast %cst_13 : f32 to vector<32x128xf32>
    %19 = arith.maximumf %17, %18 : vector<32x128xf32>
    %c1 = arith.constant 1 : index
    %c0_14 = arith.constant 0 : index
    %c0_15 = arith.constant 0 : index
    %20 = vector.load %arg3[%c1, %c0_14, %c0_15] : memref<2x32x32xbf16, #tpu.memory_space<vmem>>, vector<1x32x32xbf16>
    %21 = vector.shape_cast %20 : vector<1x32x32xbf16> to vector<32x32xbf16>
    %22 = arith.truncf %19 : vector<32x128xf32> to vector<32x128xbf16>
    %cst_16 = arith.constant dense<0.000000e+00> : vector<32x128xf32>
    %23 = tpu.matmul %21, %22, %cst_16 {dimension_numbers = #tpu.dot_dimension_numbers<[1], [0], [0], [1], [0, 0, 1, 1], [], []>} : vector<32x32xbf16>, vector<32x128xbf16>, vector<32x128xf32> -> vector<32x128xf32>
    %24 = vector.broadcast %4 : vector<32x1xf32> to vector<32x128xf32>
    %25 = arith.addf %23, %24 : vector<32x128xf32>
    %cst_17 = arith.constant 0.000000e+00 : f32
    %26 = vector.broadcast %cst_17 : f32 to vector<32x128xf32>
    %27 = arith.maximumf %25, %26 : vector<32x128xf32>
    %28 = vector.broadcast %5 : vector<32x1xf32> to vector<32x128xf32>
    %29 = arith.mulf %27, %28 : vector<32x128xf32>
    %cst_18 = arith.constant dense<0.000000e+00> : vector<128xf32>
    %30 = vector.multi_reduction <add>, %29, %cst_18 [0] : vector<32x128xf32> to vector<128xf32>
    %31 = vector.shape_cast %30 : vector<128xf32> to vector<1x128xf32>
    %32 = vector.broadcast %6 : vector<1x1xf32> to vector<1x128xf32>
    %33 = arith.addf %31, %32 : vector<1x128xf32>
    %c0_19 = arith.constant 0 : index
    %c0_20 = arith.constant 0 : index
    %34 = vector.load %arg4[%c0_19, %c0_20] : memref<1x128xf32, #tpu.memory_space<vmem>>, vector<1x128xf32>
    tpu.vector_store %arg4[%c0_19, %c0_20], %33 {strides = array<i32>} : memref<1x128xf32, #tpu.memory_space<vmem>>, vector<1x128xf32>,
    return
  }
  func.func @transform_0(%arg0: i32) -> (i32, i32) {
    %c0_i32 = arith.constant 0 : i32
    %c0_i32_0 = arith.constant 0 : i32
    return %c0_i32, %arg0 : i32, i32
  }
  func.func @transform_1(%arg0: i32) -> (i32, i32) {
    %c0_i32 = arith.constant 0 : i32
    %c0_i32_0 = arith.constant 0 : i32
    %c0_i32_1 = arith.constant 0 : i32
    return %c0_i32, %c0_i32_0 : i32, i32
  }
  func.func @transform_2(%arg0: i32) -> (i32, i32, i32) {
    %c0_i32 = arith.constant 0 : i32
    %c0_i32_0 = arith.constant 0 : i32
    %c0_i32_1 = arith.constant 0 : i32
    %c0_i32_2 = arith.constant 0 : i32
    return %c0_i32, %c0_i32_0, %c0_i32_1 : i32, i32, i32
  }
  func.func @transform_3(%arg0: i32) -> (i32, i32) {
    %c0_i32 = arith.constant 0 : i32
    %c0_i32_0 = arith.constant 0 : i32
    return %c0_i32, %arg0 : i32, i32
  }
}

</mosaic_0001>

<bundles_post_ra>
// kernel: tpu_custom_call.1
= control target key start
LH: loop header
LB: loop body
LE: loop exit
PB: predicated region body
PF: predicated region fallthrough
CT: control target
= control target key end

     0   :  { %vm42_vm0 = vcmask 64512   ;;  %v337_v2 = vmov 8   ;;  %s432_s0 = inlined_call_operand.vmem [shape: f32[8,128], index: 0, kind: input, shape index: {}]   ;;  %s433_s1 = inlined_call_operand.vmem [shape: f32[32,16], index: 1, kind: input, shape index: {}]   ;;  %s434_s2 = inlined_call_operand.vmem [shape: bf16[2,32,32], index: 2, kind: input, shape index: {}]   ;;  %s435_s3 = inlined_call_operand.hbm [shape: f32[1,128], index: 3, kind: output, shape index: {}]  }
   0x1   :  { %v16_v0 = vld [vmem:[%s432_s0] sm:$0xff]  ;;  %301 = vset.pattern.permute.xlu1 %v337_v2 }
   0x2   :  { %v369_v1 = vld [vmem:[%s433_s1] sm:$0xff]  ;;  %66 = vmatpush.msra.mxu0 %v16_v0 }
   0x3   :  { %8 = vsyncpa [#allocation3], 0  ;;  %260 = vmatmul.msk.f32.vlgmr.msra.gmra.mxu0 %vm42_vm0, %v369_v1  ;;  %24 = vperm.xlu1 %301, %v369_v1   ;;  %v377_v3 = vld [vmem:[%s433_s1 + $0x10] sm:$0xff]  ;;  %v383_v4 = vld [vmem:[%s433_s1 + $0x8] sm:$0xff]  ;;  %v338_v7 = vmov 9   ;;  %vm116_vm1 = vcmask 261120  }
   0x4   :  { %300 = vset.pattern.permute.xlu0 %v337_v2  ;;  %v391_v5 = vld [vmem:[%s433_s1 + $0x18] sm:$0xff]  ;;  %302 = vset.pattern.permute.xlu2 %v338_v7  ;;  %v289_v25 = vld [vmem:[%s434_s2 + $0x8] sm:$0xff]  ;;  %v288_v26 = vld [vmem:[%s434_s2] sm:$0xff]  ;;  %v339_v27 = vmov 10   ;;  %v340_v36 = vmov 11   ;;  %v341_v37 = vmov 12  }
   0x5   :  { %34 = vperm.xlu0 %300, %v377_v3   ;;  %99 = vperm.xlu2 %302, %v377_v3   ;;  %v21_v34 = vld [vmem:[%s433_s1] sm:$0x1]  ;;  %v290_v49 = vld [vmem:[%s434_s2 + $0x10] sm:$0xff]  ;;  %v291_v50 = vld [vmem:[%s434_s2 + $0x18] sm:$0xff]  ;;  %s342_s2 = smov [#allocation2]   ;;  %s251_s6 = sshll.u32 %s435_s3, 4  ;;  %s252_s6 = int_to_ptr.hbm [resolvable:$true] %s251_s6 }
   0x6   :  { %s249_s30 = sshll.u32 %s342_s2, 4  ;;  %s250_s30 = int_to_ptr.vmem [resolvable:$true] %s249_s30 }
   0xb   :  { %261 = vmatmul.msk.f32.gmra.mxu0 %vm42_vm0, %v383_v4  ;;  %29 = vperm.xlu1 %301, %v383_v4  }
   0xd   :  { %39 = vperm.xlu0 %300, %v391_v5   ;;  %103 = vperm.xlu2 %302, %v391_v5  }
  0x13   :  { %262 = vmatmul.msk.f32.gmra.mxu0 %vm42_vm0, %v377_v3  ;;  %304 = vset.pattern.permute.xlu1 %v338_v7 }
  0x14   :  { %95 = vperm.xlu1 %304, %v383_v4  }
  0x15   :  { %303 = vset.pattern.permute.xlu0 %v338_v7  ;;  %305 = vset.pattern.permute.xlu2 %v339_v27 }
  0x16   :  { %91 = vperm.xlu0 %303, %v369_v1   ;;  %154 = vperm.xlu2 %305, %v369_v1  }
  0x1b   :  { %263 = vmatmul.msk.f32.gmra.mxu0 %vm42_vm0, %v391_v5 }
  0x1c   :  { %306 = vset.pattern.permute.xlu1 %v339_v27 }
  0x1d   :  { %158 = vperm.xlu1 %306, %v383_v4  }
  0x1e   :  { %307 = vset.pattern.permute.xlu0 %v339_v27  ;;  %162 = vperm.xlu2 %305, %v377_v3  }
  0x1f   :  { %166 = vperm.xlu0 %307, %v391_v5  }
  0x25   :  { %308 = vset.pattern.permute.xlu1 %v340_v36 }
  0x26   :  { %209 = vperm.xlu1 %308, %v369_v1   ;;  %309 = vset.pattern.permute.xlu2 %v340_v36 }
  0x27   :  { %310 = vset.pattern.permute.xlu0 %v341_v37  ;;  %213 = vperm.xlu2 %309, %v383_v4  }
  0x28   :  { %239 = vperm.xlu0 %310, %v21_v34  }
  0x2e   :  { %217 = vperm.xlu1 %308, %v377_v3  }
  0x2f   :  { %221 = vperm.xlu2 %309, %v391_v5  }
  0x5f   :  { %v100_v29 = vpop.permute.xlu2 %99 }
  0x67   :  { %v104_v38 = vpop.permute.xlu2 %103 }
  0x70   :  { %v155_v51 = vpop.permute.xlu2 %154 }
  0x75   :  { %v25_v9 = vpop.permute.xlu1 %24 }
  0x77   :  { %v35_v10 = vpop.permute.xlu0 %34 }
  0x78   :  { %v163_v54 = vpop.permute.xlu2 %162 }
  0x7d   :  { %v30_v12 = vpop.permute.xlu1 %29 }
  0x7f   :  { %v40_v14 = vpop.permute.xlu0 %39 }
  0x80   :  { %v68_v6 = vpop.f32.mrf.mxu0 }
  0x81   :  { %v69_v18 = vadd.f32 %v68_v6, %v25_v9  ;;  %v214_v61 = vpop.permute.xlu2 %213 }
  0x83   :  { %v80_v23 = vmax.f32 %v69_v18, 0.0 }
  0x86   :  { %v96_v32 = vpop.permute.xlu1 %95 }
  0x88   :  { %v71_v8 = vpop.f32.mrf.mxu0  ;;  %v92_v31 = vpop.permute.xlu0 %91 }
  0x89   :  { %v72_v16 = vadd.f32 %v71_v8, %v30_v12 }
  0x8b   :  { %v81_v21 = vmax.f32 %v72_v16, 0.0 }
  0x8d   :  { %v88_v24 = vpack.c.bf16 %v81_v21, %v80_v23 }
  0x8f   :  { %v159_v53 = vpop.permute.xlu1 %158 }
  0x90   :  { %v74_v11 = vpop.f32.mrf.mxu0 }
  0x91   :  { %v75_v13 = vadd.f32 %v74_v11, %v35_v10  ;;  %v167_v1 = vpop.permute.xlu0 %166  ;;  %v222_v10 = vpop.permute.xlu2 %221 }
  0x93   :  { %v82_v19 = vmax.f32 %v75_v13, 0.0 }
  0x98   :  { %v77_v15 = vpop.f32.mrf.mxu0  ;;  %v210_v57 = vpop.permute.xlu1 %209 }
  0x99   :  { %v78_v17 = vadd.f32 %v77_v15, %v40_v14 }
  0x9b   :  { %v83_v20 = vmax.f32 %v78_v17, 0.0 }
  0x9d   :  { %v89_v22 = vpack.c.bf16 %v83_v20, %v82_v19  ;;  %v240_v19 = vpop.permute.xlu0 %239 }
  0x9f   :  { %129 = vmatpush.bf16.msra.mxu1 %v89_v22  ;;  %292 = vmatpush.bf16.msra.mxu3 %v89_v22 }
  0xa0   :  { %v218_v3 = vpop.permute.xlu1 %217 }
  0xa3   :  { %130 = vmatpush.bf16.msra.mxu1 %v88_v24  ;;  %293 = vmatpush.bf16.msra.mxu3 %v88_v24 }
  0xa6   :  { %273 = vmatmul.msk.bf16.vlgmr.msra.gmra.mxu3 %vm116_vm1, %v289_v25  ;;  %272 = vmatmul.msk.bf16.vlgmr.msra.gmra.mxu1 %vm116_vm1, %v288_v26 }
 0x123   :  { %v132_v28 = vpop.f32.mrf.mxu1 }
 0x124   :  { %v133_v40 = vadd.f32 %v132_v28, %v92_v31 }
 0x126   :  { %v142_v45 = vmax.f32 %v133_v40, 0.0 }
 0x129   :  { %v137_v30 = vpop.f32.mrf.mxu3 }
 0x12a   :  { %v138_v35 = vadd.f32 %v137_v30, %v100_v29 }
 0x12b   :  { %v134_v33 = vpop.f32.mrf.mxu1 }
 0x12c   :  { %v135_v41 = vadd.f32 %v134_v33, %v96_v32  ;;  %v144_v43 = vmax.f32 %v138_v35, 0.0 }
 0x12e   :  { %v143_v46 = vmax.f32 %v135_v41, 0.0 }
 0x130   :  { %v151_v48 = vpack.c.bf16 %v143_v46, %v142_v45 }
 0x131   :  { %v139_v39 = vpop.f32.mrf.mxu3 }
 0x132   :  { %v140_v42 = vadd.f32 %v139_v39, %v104_v38 }
 0x134   :  { %v145_v44 = vmax.f32 %v140_v42, 0.0 }
 0x136   :  { %v152_v47 = vpack.c.bf16 %v145_v44, %v144_v43 }
 0x138   :  { %191 = vmatpush.bf16.msra.mxu2 %v152_v47 }
 0x13c   :  { %192 = vmatpush.bf16.msra.mxu2 %v151_v48 }
 0x13f   :  { %286 = vmatmul.msk.bf16.vlgmr.msra.gmra.mxu2 %vm116_vm1, %v290_v49 }
 0x14f   :  { %287 = vmatmul.msk.bf16.gmra.mxu2 %vm116_vm1, %v291_v50 }
 0x1c2   :  { %v194_v52 = vpop.f32.mrf.mxu2 }
 0x1c3   :  { %v195_v59 = vadd.f32 %v194_v52, %v155_v51 }
 0x1c5   :  { %v204_v63 = vmax.f32 %v195_v59, 0.0 }
 0x1c7   :  { %v224_v5 = vmul.f32 %v210_v57, %v204_v63 }
 0x1ca   :  { %v196_v55 = vpop.f32.mrf.mxu2 }
 0x1cb   :  { %v197_v56 = vadd.f32 %v196_v55, %v159_v53 }
 0x1cd   :  { %v205_v62 = vmax.f32 %v197_v56, 0.0 }
 0x1cf   :  { %v225_v2 = vmul.f32 %v214_v61, %v205_v62 }
 0x1d1   :  { %v228_v8 = vadd.f32 %v225_v2, %v224_v5 }
 0x1d2   :  { %v199_v58 = vpop.f32.mrf.mxu2 }
 0x1d3   :  { %v200_v60 = vadd.f32 %v199_v58, %v163_v54 }
 0x1d5   :  { %v206_v0 = vmax.f32 %v200_v60, 0.0 }
 0x1d7   :  { %v226_v6 = vmul.f32 %v218_v3, %v206_v0 }
 0x1d9   :  { %v229_v11 = vadd.f32 %v228_v8, %v226_v6 }
 0x1da   :  { %v201_v4 = vpop.f32.mrf.mxu2 }
 0x1db   :  { %v202_v7 = vadd.f32 %v201_v4, %v167_v1 }
 0x1dd   :  { %v207_v9 = vmax.f32 %v202_v7, 0.0 }
 0x1df   :  { %v227_v12 = vmul.f32 %v222_v10, %v207_v9 }
 0x1e1   :  { %v230_v13 = vadd.f32 %v229_v11, %v227_v12 }
 0x1e3   :  { %v231_v14 = vrot.slane %v230_v13, 4 }
 0x1e5   :  { %v232_v15 = vadd.f32 %v231_v14, %v230_v13 }
 0x1e7   :  { %v233_v16 = vrot.slane %v232_v15, 2 }
 0x1e9   :  { %v234_v17 = vadd.f32 %v233_v16, %v232_v15 }
 0x1eb   :  { %v235_v18 = vrot.slane %v234_v17, 1 }
 0x1ed   :  { %v236_v20 = vadd.f32 %v235_v18, %v234_v17 }
 0x1ef   :  { %v242_v21 = vadd.f32 %v240_v19, %v236_v20 }
 0x1f1   :  { %243 = vst [vmem:[#allocation2] sm:$0x1] %v242_v21 }
 0x1f2   :  { %254 = dma.vmem_to_hbm [thread:$0]  %s250_s30, 16, %s252_s6, [#allocation3]  }
 0x1f3   :  { %335 = dma.done.wait [#allocation3], 16  }
 0x1f4   :  { %336 = vsyncadd [#allocation3], 4294967280 }
 0x1f5   :  { %259 = vsyncpa [#allocation3], 1 }

</bundles_post_ra>
